<compile_context>
chip_gen: v7x
topology: tpu7x:2x2x1
jax: 0.10.0
libtpu: 0.0.40
codegen_flags: <defaults>
</compile_context>

<pallas_src>
import jax
import jax.numpy as jnp
from jax.experimental import pallas as pl
from jax.experimental.pallas import tpu as pltpu


_MiB = 1024 * 1024


def _cdiv(a, b):
    return -(-a // b)


def _round_up(x, m):
    return ((x + m - 1) // m) * m


def _sublane(dtype):
    """Native sublane pack for a dtype: 8 (f32), 16 (bf16), 32 (int8/fp8)."""
    return max(8, 32 // max(1, jnp.dtype(dtype).itemsize))


def _vmem_budget_and_limit():
    """Chip-aware (budget, scoped-limit) pair.

    v5e/v6e have 128 MiB of VMEM per TensorCore -> ~96/104 MiB lets tm grow to
    512+ so the weight stream is re-read fewer times.  v7x has only 64 MiB ->
    ~44/52 MiB keeps headroom for Mosaic internal scratch.
    """
    try:
        phys = pltpu.get_tpu_info().vmem_capacity_bytes
    except Exception:  # pragma: no cover - conservative (v7x-sized) fallback
        phys = 64 * _MiB
    if phys >= 100 * _MiB:
        return 96 * _MiB, 104 * _MiB
    return 44 * _MiB, 52 * _MiB


def plan_mlp(M, d_in, H, *, compute_dtype=jnp.bfloat16, out_dtype=jnp.float32,
             tm_max=512, th_max=1024, min_row_tiles=2,
             vmem_budget=None, vmem_limit=None):
    """Pick (tm, th) row/hidden tiles and padded problem sizes."""
    default_budget, default_limit = _vmem_budget_and_limit()
    vmem_budget = default_budget if vmem_budget is None else vmem_budget
    vmem_limit = default_limit if vmem_limit is None else vmem_limit

    compute_dtype = jnp.dtype(compute_dtype)
    out_dtype = jnp.dtype(out_dtype)
    c_bytes = compute_dtype.itemsize
    o_bytes = out_dtype.itemsize
    sub = _sublane(compute_dtype)

    d_pad = _round_up(d_in, 128)

    # Row tiling: keep padding waste small (tm ~ cdiv(M, n_row)) and give the
    # "parallel" row axis at least two tiles whenever M allows, so v7x's two
    # TensorCores both get work.
    n_row = max(1, _cdiv(M, tm_max))
    if M > sub:
        n_row = max(n_row, min_row_tiles)
    tm = min(tm_max, _round_up(_cdiv(M, n_row), sub))
    th = min(th_max, _round_up(H, 128))

    def vmem_bytes(tm_, th_):
        acc = tm_ * d_pad * 4                              # f32 accumulator (scratch)
        x_io = 2 * tm_ * d_pad * (c_bytes + o_bytes)       # x + out tiles, double-buffered
        w = 2 * 3 * th_ * d_pad * c_bytes                  # [Wg|Wu] + Wd^T, double-buffered
        inter = tm_ * th_ * (2 * 4 + 4 + c_bytes)          # gu(f32) + hidden(f32) + hidden cast
        return acc + x_io + w + inter

    # Shrink order: th down to 256 first (keep the down-proj contraction dim
    # filling a 256-wide MXU), then tm down to the sublane pack, then th down
    # to 128 only as a last resort.
    while vmem_bytes(tm, th) > vmem_budget and th > 256:
        th = max(256, _round_up(th // 2, 128))
    while vmem_bytes(tm, th) > vmem_budget and tm > sub:
        tm = max(sub, _round_up(tm // 2, sub))
    while vmem_bytes(tm, th) > vmem_budget and th > 128:
        th = max(128, _round_up(th // 2, 128))

    # TODO(synk): for decode-sized M (single row tile) a second "parallel" grid
    # axis over d_pad output columns would keep both v7x cores busy.
    return dict(tm=tm, th=th, M_pad=_round_up(M, tm), d_pad=d_pad,
                H_pad=_round_up(H, th), d_in=d_in, H=H,
                compute_dtype=compute_dtype, out_dtype=out_dtype,
                vmem_limit=vmem_limit)


def prepare_mlp_weights(w_gate, w_up, w_down, plan):
    """One-time weight prep: cast to compute dtype, transpose, pad, pack.

    w_gate, w_up: (H, d_in) (PyTorch Linear layout); w_down: (d_in, H).
    Returns wgu: (d_pad, 2*H_pad) packed so columns [2*h*th:(2*h+2)*th] hold
    [Wg_tile_h | Wu_tile_h], and wd_t: (H_pad, d_pad) = padded Wd^T.
    """
    d_in, H = plan["d_in"], plan["H"]
    d_pad, H_pad, th = plan["d_pad"], plan["H_pad"], plan["th"]
    cdt = plan["compute_dtype"]

    wg_t = jnp.zeros((d_pad, H_pad), cdt).at[:d_in, :H].set(w_gate.T.astype(cdt))
    wu_t = jnp.zeros((d_pad, H_pad), cdt).at[:d_in, :H].set(w_up.T.astype(cdt))
    n_t = H_pad // th
    wgu = jnp.stack(
        [wg_t.reshape(d_pad, n_t, th), wu_t.reshape(d_pad, n_t, th)], axis=2
    ).reshape(d_pad, 2 * H_pad)

    wd_t = jnp.zeros((H_pad, d_pad), cdt).at[:H, :d_in].set(w_down.T.astype(cdt))
    return wgu, wd_t


def _mlp_kernel(x_ref, wgu_ref, wd_ref, o_ref, acc_ref):
    """One (row-tile, H-tile) step: accumulate (silu(g)*u) @ Wd_tile into acc."""
    h = pl.program_id(1)

    @pl.when(h == 0)
    def _():
        acc_ref[...] = jnp.zeros_like(acc_ref)

    th = wd_ref.shape[0]
    x = x_ref[...]                                               # (tm, d_pad)
    # Single MXU pass for gate & up: x @ [Wg_tile | Wu_tile] -> (tm, 2*th), f32 acc.
    gu = jnp.dot(x, wgu_ref[...], preferred_element_type=jnp.float32)
    g = gu[:, :th]
    u = gu[:, th:]
    hidden = (g * jax.nn.sigmoid(g)) * u                         # SwiGLU in f32
    acc_ref[...] += jnp.dot(hidden.astype(wd_ref.dtype), wd_ref[...],
                            preferred_element_type=jnp.float32)

    @pl.when(h == pl.num_programs(1) - 1)
    def _():
        o_ref[...] = acc_ref[...].astype(o_ref.dtype)


def parallel_mlp_forward(x, wgu, wd_t, plan):
    """x: (M, d_in) -> (M, d_in), using pre-packed weights from prepare_mlp_weights."""
    M, d_in = x.shape
    assert d_in == plan["d_in"]
    tm, th = plan["tm"], plan["th"]
    d_pad, H_pad = plan["d_pad"], plan["H_pad"]
    cdt, odt = plan["compute_dtype"], plan["out_dtype"]
    M_pad = _round_up(M, tm)
    assert H_pad % th == 0

    if x.dtype != cdt:
        x = x.astype(cdt)
    if d_in != d_pad:
        x_p = jnp.zeros((M_pad, d_pad), cdt).at[:M, :d_in].set(x)
    elif M != M_pad:
        x_p = jnp.pad(x, ((0, M_pad - M), (0, 0)))   # row-only padding, no full-slab copy
    else:
        x_p = x

    c_bytes = cdt.itemsize
    n_row_tiles = M_pad // tm
    grid = (n_row_tiles, H_pad // th)                # reduction (H) axis last

    out_p = pl.pallas_call(
        _mlp_kernel,
        out_shape=jax.ShapeDtypeStruct((M_pad, d_pad), odt),
        grid=grid,
        in_specs=[
            pl.BlockSpec((tm, d_pad), lambda i, h: (i, 0)),       # x row tile
            pl.BlockSpec((d_pad, 2 * th), lambda i, h: (0, h)),   # [Wg|Wu] H tile
            pl.BlockSpec((th, d_pad), lambda i, h: (h, 0)),       # Wd^T H tile
        ],
        out_specs=pl.BlockSpec((tm, d_pad), lambda i, h: (i, 0)),
        scratch_shapes=[pltpu.VMEM((tm, d_pad), jnp.float32)],    # f32 accumulator
        compiler_params=pltpu.CompilerParams(
            dimension_semantics=("parallel", "arbitrary"),
            vmem_limit_bytes=plan["vmem_limit"],
        ),
        cost_estimate=pl.CostEstimate(
            flops=6 * M_pad * d_pad * H_pad,
            transcendentals=M_pad * H_pad,
            bytes_accessed=int(
                x_p.size * c_bytes
                + M_pad * d_pad * odt.itemsize
                + n_row_tiles * (wgu.size + wd_t.size) * c_bytes),  # weights re-read per row tile
        ),
    )(x_p, wgu, wd_t)

    if (M, d_in) != (M_pad, d_pad):
        out_p = out_p[:M, :d_in]
    return out_p


def parallel_mlp(x, w_gate, w_up, w_down, **plan_kwargs):
    """Convenience wrapper: plan + (one-time) weight prep + forward.

    In a real model, call plan_mlp / prepare_mlp_weights once at init and reuse.
    """
    M, d_in = x.shape
    H = w_gate.shape[0]
    assert w_gate.shape == (H, d_in)
    assert w_up.shape == (H, d_in)
    assert w_down.shape == (d_in, H)
    plan_kwargs.setdefault("out_dtype", x.dtype)
    plan = plan_mlp(M, d_in, H, **plan_kwargs)
    wgu, wd_t = prepare_mlp_weights(w_gate, w_up, w_down, plan)
    return parallel_mlp_forward(x, wgu, wd_t, plan)


if __name__ == "__main__":
    def _ref(x, wg, wu, wd):
        g = x @ wg.T
        u = x @ wu.T
        return (g * jax.nn.sigmoid(g) * u) @ wd.T

    key = jax.random.PRNGKey(0)

    # ---- Test 1: small, non-128-aligned shapes, full-precision f32 compute
    # path (exercises pad + slice path with a tight tolerance).
    M, D_IN, H = 8, 32, 64
    k1, k2, k3, k4, key = jax.random.split(key, 5)
    x = jax.random.normal(k1, (M, D_IN), jnp.float32)
    wg = jax.random.normal(k2, (H, D_IN), jnp.float32) * 0.1   # gate_proj.weight
    wu = jax.random.normal(k3, (H, D_IN), jnp.float32) * 0.1   # up_proj.weight
    wd = jax.random.normal(k4, (D_IN, H), jnp.float32) * 0.1   # down_proj.weight
    out = jax.block_until_ready(
        parallel_mlp(x, wg, wu, wd, compute_dtype=jnp.float32))
    assert out.shape == (M, D_IN) and out.dtype == x.dtype
    assert jnp.allclose(out, _ref(x, wg, wu, wd), atol=1e-4, rtol=1e-4)

    # ---- Test 2: 128-aligned shapes with multiple row tiles and multiple
    # H tiles, default bf16-compute / f32-accumulate fast path (exercises the
    # accumulator reduction axis and the parallel row axis).
    M, D_IN, H = 128, 128, 512
    k1, k2, k3, k4, key = jax.random.split(key, 5)
    x = jax.random.normal(k1, (M, D_IN), jnp.float32)
    wg = jax.random.normal(k2, (H, D_IN), jnp.float32) * 0.05
    wu = jax.random.normal(k3, (H, D_IN), jnp.float32) * 0.05
    wd = jax.random.normal(k4, (D_IN, H), jnp.float32) * 0.05
    out2 = jax.block_until_ready(
        parallel_mlp(x, wg, wu, wd, tm_max=64, th_max=256))
    assert out2.shape == (M, D_IN) and out2.dtype == x.dtype
    assert jnp.allclose(out2, _ref(x, wg, wu, wd), atol=5e-2, rtol=5e-2)

    print("KERNEL_OK")
</pallas_src>

<mosaic_0001>
module attributes {stable_mosaic.version = 11 : i64} {
  func.func @_mlp_kernel(%arg0: i32, %arg1: i32, %arg2: memref<8x128xf32, #tpu.memory_space<vmem>>, %arg3: memref<128x256xf32, #tpu.memory_space<vmem>>, %arg4: memref<128x128xf32, #tpu.memory_space<vmem>>, %arg5: memref<8x128xf32, #tpu.memory_space<vmem>>, %arg6: memref<8x128xf32, #tpu.memory_space<vmem>>) attributes {dimension_semantics = [#tpu.dimension_semantics<parallel>, #tpu.dimension_semantics<arbitrary>], iteration_bounds = array<i64: 1, 1>, scalar_prefetch = 0 : i64, scratch_operands = 1 : i64, tpu.core_type = #tpu.core_type<tc>, window_params = [{transform_indices = @transform_0, window_bounds = array<i64: 8, 128>}, {transform_indices = @transform_1, window_bounds = array<i64: 128, 256>}, {transform_indices = @transform_2, window_bounds = array<i64: 128, 128>}, {transform_indices = @transform_3, window_bounds = array<i64: 8, 128>}]} {
    %c0_i32 = arith.constant 0 : i32
    %0 = arith.cmpi eq, %arg1, %c0_i32 : i32
    %1 = arith.extui %0 : i1 to i32
    %c0_i32_0 = arith.constant 0 : i32
    %2 = arith.cmpi ne, %1, %c0_i32_0 : i32
    scf.if %2 {
      %cst_14 = arith.constant 0.000000e+00 : f32
      %23 = vector.broadcast %cst_14 : f32 to vector<8x128xf32>
      %c0_15 = arith.constant 0 : index
      %c0_16 = arith.constant 0 : index
      %24 = vector.load %arg6[%c0_15, %c0_16] : memref<8x128xf32, #tpu.memory_space<vmem>>, vector<8x128xf32>
      tpu.vector_store %arg6[%c0_15, %c0_16], %23 {strides = array<i32>} : memref<8x128xf32, #tpu.memory_space<vmem>>, vector<8x128xf32>,
    } else {
    }
    %c0 = arith.constant 0 : index
    %c0_1 = arith.constant 0 : index
    %3 = vector.load %arg2[%c0, %c0_1] : memref<8x128xf32, #tpu.memory_space<vmem>>, vector<8x128xf32>
    %c0_2 = arith.constant 0 : index
    %c0_3 = arith.constant 0 : index
    %4 = vector.load %arg3[%c0_2, %c0_3] : memref<128x256xf32, #tpu.memory_space<vmem>>, vector<128x256xf32>
    %cst = arith.constant dense<0.000000e+00> : vector<8x256xf32>
    %5 = tpu.matmul %3, %4, %cst {dimension_numbers = #tpu.dot_dimension_numbers<[1], [0], [0], [1], [0, 0, 1, 1], [], []>} : vector<8x128xf32>, vector<128x256xf32>, vector<8x256xf32> -> vector<8x256xf32>
    %6 = vector.extract_strided_slice %5 {offsets = [0, 0], sizes = [8, 128], strides = [1, 1]} : vector<8x256xf32> to vector<8x128xf32>
    %7 = vector.extract_strided_slice %5 {offsets = [0, 128], sizes = [8, 128], strides = [1, 1]} : vector<8x256xf32> to vector<8x128xf32>
    %8 = arith.negf %6 : vector<8x128xf32>
    %9 = math.exp %8 : vector<8x128xf32>
    %cst_4 = arith.constant 1.000000e+00 : f32
    %10 = vector.broadcast %cst_4 : f32 to vector<8x128xf32>
    %11 = arith.addf %10, %9 : vector<8x128xf32>
    %12 = arith.divf %10, %11 : vector<8x128xf32>
    %13 = arith.mulf %6, %12 : vector<8x128xf32>
    %14 = arith.mulf %13, %7 : vector<8x128xf32>
    %c0_5 = arith.constant 0 : index
    %c0_6 = arith.constant 0 : index
    %15 = vector.load %arg6[%c0_5, %c0_6] : memref<8x128xf32, #tpu.memory_space<vmem>>, vector<8x128xf32>
    %c0_7 = arith.constant 0 : index
    %c0_8 = arith.constant 0 : index
    %16 = vector.load %arg4[%c0_7, %c0_8] : memref<128x128xf32, #tpu.memory_space<vmem>>, vector<128x128xf32>
    %cst_9 = arith.constant dense<0.000000e+00> : vector<8x128xf32>
    %17 = tpu.matmul %14, %16, %cst_9 {dimension_numbers = #tpu.dot_dimension_numbers<[1], [0], [0], [1], [0, 0, 1, 1], [], []>} : vector<8x128xf32>, vector<128x128xf32>, vector<8x128xf32> -> vector<8x128xf32>
    %18 = arith.addf %15, %17 : vector<8x128xf32>
    %c0_10 = arith.constant 0 : index
    %c0_11 = arith.constant 0 : index
    %19 = vector.load %arg6[%c0_10, %c0_11] : memref<8x128xf32, #tpu.memory_space<vmem>>, vector<8x128xf32>
    tpu.vector_store %arg6[%c0_10, %c0_11], %18 {strides = array<i32>} : memref<8x128xf32, #tpu.memory_space<vmem>>, vector<8x128xf32>,
    %c0_i32_12 = arith.constant 0 : i32
    %20 = arith.cmpi eq, %arg1, %c0_i32_12 : i32
    %21 = arith.extui %20 : i1 to i32
    %c0_i32_13 = arith.constant 0 : i32
    %22 = arith.cmpi ne, %21, %c0_i32_13 : i32
    scf.if %22 {
      %c0_14 = arith.constant 0 : index
      %c0_15 = arith.constant 0 : index
      %23 = vector.load %arg6[%c0_14, %c0_15] : memref<8x128xf32, #tpu.memory_space<vmem>>, vector<8x128xf32>
      %c0_16 = arith.constant 0 : index
      %c0_17 = arith.constant 0 : index
      %24 = vector.load %arg5[%c0_16, %c0_17] : memref<8x128xf32, #tpu.memory_space<vmem>>, vector<8x128xf32>
      tpu.vector_store %arg5[%c0_16, %c0_17], %23 {strides = array<i32>} : memref<8x128xf32, #tpu.memory_space<vmem>>, vector<8x128xf32>,
    } else {
    }
    return
  }
  func.func @transform_0(%arg0: i32, %arg1: i32) -> (i32, i32) {
    %c0_i32 = arith.constant 0 : i32
    %c0_i32_0 = arith.constant 0 : i32
    return %arg0, %c0_i32 : i32, i32
  }
  func.func @transform_1(%arg0: i32, %arg1: i32) -> (i32, i32) {
    %c0_i32 = arith.constant 0 : i32
    %c0_i32_0 = arith.constant 0 : i32
    return %c0_i32, %arg1 : i32, i32
  }
  func.func @transform_2(%arg0: i32, %arg1: i32) -> (i32, i32) {
    %c0_i32 = arith.constant 0 : i32
    %c0_i32_0 = arith.constant 0 : i32
    return %arg1, %c0_i32 : i32, i32
  }
  func.func @transform_3(%arg0: i32, %arg1: i32) -> (i32, i32) {
    %c0_i32 = arith.constant 0 : i32
    %c0_i32_0 = arith.constant 0 : i32
    return %arg0, %c0_i32 : i32, i32
  }
}

</mosaic_0001>

<bundles_post_ra>
// kernel: tpu_custom_call.1
= control target key start
LH: loop header
LB: loop body
LE: loop exit
PB: predicated region body
PF: predicated region fallthrough
CT: control target
= control target key end

     0   :  { %8 = vsyncpa [#allocation4], 0  ;;  %s588_s0 = inlined_call_operand.hbm [shape: f32[8,128], index: 0, kind: input, shape index: {}]   ;;  %s589_s1 = inlined_call_operand.hbm [shape: f32[128,256], index: 1, kind: input, shape index: {}]   ;;  %s590_s2 = inlined_call_operand.hbm [shape: f32[128,128], index: 2, kind: input, shape index: {}]   ;;  %s591_s3 = inlined_call_operand.hbm [shape: f32[8,128], index: 3, kind: output, shape index: {}]  }
   0x1   :  { %9 = vsyncpa [#allocation7], 0 }
   0x2   :  { %10 = vsyncpa [#allocation5], 0  ;;  %s499_s12 = smov [#allocation6]   ;;  %s405_s16 = scalar_lea.hbm %s589_s1, 4096 }
   0x3   :  { %s26_s13 = sshll.u32 %s499_s12, 4  ;;  %p406_p0 = scmp.ne.s32.totalorder %s589_s1, %s405_s16  ;;  %s27_s13 = int_to_ptr.vmem [resolvable:$true] %s26_s13 }
   0x4   :  { %p409_p1 = scmp.lt.u32.totalorder %s405_s16, %s589_s1 }
   0x6   :  { %p411_p2 = pnand %p409_p1, %p406_p0 }
   0x8   :  { %414 = shalt.err (!%p411_p2)
}
   0x9   :  { %s415_s21 = scalar_lea.vmem %s27_s13, 4096  ;;  %p420_p4 = scmp.lt.s32.totalorder %s27_s13, %s27_s13 }
   0xa   :  { %p416_p3 = scmp.ne.s32.totalorder %s27_s13, %s415_s21  ;;  %p421_p5 = scmp.lt.s32.totalorder %s415_s21, %s415_s21 }
   0xc   :  { %p422_p6 = por %p421_p5, %p420_p4 }
   0xe   :  { %p423_p7 = pnand %p422_p6, %p416_p3 }
  0x10   :  { %426 = shalt.err (!%p423_p7)
}
  0x11   :  { %s500_s22 = smov 256   ;;  %s501_s23 = smov 16  }
  0x12   :  { %32 = dma.hbm_to_vmem [thread:$0]  %s589_s1, 4096, %s27_s13, [#allocation7], %s500_s22, %s500_s22, %s501_s23  }
  0x13   :  { %s502_s26 = smov [#allocation3]   ;;  %s503_s28 = smov [#allocation8]  }
  0x14   :  { %s17_s27 = sshll.u32 %s502_s26, 4  ;;  %s38_s29 = sshll.u32 %s503_s28, 4  ;;  %s18_s27 = int_to_ptr.vmem [resolvable:$true] %s17_s27  ;;  %s39_s29 = int_to_ptr.vmem [resolvable:$true] %s38_s29 }
  0x15   :  { %s427_s5 = scalar_lea.hbm %s588_s0, 128 }
  0x16   :  { %p428_p8 = scmp.ne.s32.totalorder %s588_s0, %s427_s5  ;;  %p431_p9 = scmp.lt.u32.totalorder %s427_s5, %s588_s0 }
  0x18   :  { %p433_p10 = pnand %p431_p9, %p428_p8 }
  0x1a   :  { %436 = shalt.err (!%p433_p10)
}
  0x1b   :  { %s437_s1 = scalar_lea.vmem %s18_s27, 128  ;;  %p442_p12 = scmp.lt.s32.totalorder %s18_s27, %s18_s27 }
  0x1c   :  { %p438_p11 = scmp.ne.s32.totalorder %s18_s27, %s437_s1  ;;  %p443_p13 = scmp.lt.s32.totalorder %s437_s1, %s437_s1 }
  0x1e   :  { %p444_p0 = por %p443_p13, %p442_p12 }
  0x20   :  { %p445_p1 = pnand %p444_p0, %p438_p11 }
  0x22   :  { %448 = shalt.err (!%p445_p1)
}
  0x23   :  { %20 = dma.hbm_to_vmem [thread:$0]  %s588_s0, 128, %s18_s27, [#allocation4]  }
  0x24   :  { %s449_s14 = scalar_lea.hbm %s590_s2, 2048 }
  0x25   :  { %p450_p2 = scmp.ne.s32.totalorder %s590_s2, %s449_s14  ;;  %p453_p3 = scmp.lt.u32.totalorder %s449_s14, %s590_s2 }
  0x27   :  { %p455_p4 = pnand %p453_p3, %p450_p2 }
  0x29   :  { %458 = shalt.err (!%p455_p4)
}
  0x2a   :  { %s459_s19 = scalar_lea.vmem %s39_s29, 2048  ;;  %p464_p6 = scmp.lt.s32.totalorder %s39_s29, %s39_s29 }
  0x2b   :  { %p460_p5 = scmp.ne.s32.totalorder %s39_s29, %s459_s19  ;;  %p465_p7 = scmp.lt.s32.totalorder %s459_s19, %s459_s19 }
  0x2d   :  { %p466_p8 = por %p465_p7, %p464_p6 }
  0x2f   :  { %p467_p9 = pnand %p466_p8, %p460_p5 }
  0x31   :  { %470 = shalt.err (!%p467_p9)
}
  0x32   :  { %s504_s0 = smov 128   ;;  %s505_s20 = smov 8  }
  0x33   :  { %44 = dma.hbm_to_vmem [thread:$0]  %s590_s2, 2048, %s39_s29, [#allocation7], %s504_s0, %s504_s0, %s505_s20  }
  0x34   :  { %493 = dma.done.wait [#allocation4], 128  }
  0x35   :  { %494 = vsyncadd [#allocation4], 4294967168 }
  0x36   :  { %495 = dma.done.wait [#allocation7], 6144  }
  0x37   :  { %496 = vsyncadd [#allocation7], 4294961152  ;;  %v506_v0 = vmov 0.0   ;;  %v507_v1 = vmov 0.0|0.0   ;;  %v61_v2 = vld [vmem:[#allocation6 + $0x8] sm:$0xff]  ;;  %v63_v3 = vld [vmem:[#allocation6 + $0x18] sm:$0xff] }
  0x38   :  { %156 = vmatprep.mubr.f32.mxu0 %v506_v0  ;;  %366 = vmatprep.subr.bf16.mxu1 %v507_v1  ;;  %v60_v4 = vld [vmem:[#allocation6] sm:$0xff]  ;;  %v334_v5 = vpack.c.bf16 %v63_v3, %v61_v2  ;;  %v62_v6 = vld [vmem:[#allocation6 + $0x10] sm:$0xff]  ;;  %v65_v7 = vld [vmem:[#allocation6 + $0x28] sm:$0xff]  ;;  %vm508_vm0 = vmmov 0   ;;  %s509_s2 = smov [#allocation9]  }
  0x39   :  { %v67_v8 = vld [vmem:[#allocation6 + $0x38] sm:$0xff]  ;;  %v336_v9 = vpack.c.bf16 %v62_v6, %v60_v4  ;;  %v64_v11 = vld [vmem:[#allocation6 + $0x20] sm:$0xff]  ;;  %v66_v12 = vld [vmem:[#allocation6 + $0x30] sm:$0xff]  ;;  %331 = vmatprep.mubr.msk.f32.mxu1 %vm508_vm0, %v506_v0  ;;  %s271_s23 = sshll.u32 %s509_s2, 4  ;;  %s272_s23 = int_to_ptr.vmem [resolvable:$true] %s271_s23 }
  0x3a   :  { %v338_v10 = vpack.c.bf16 %v67_v8, %v65_v7  ;;  %v69_v13 = vld [vmem:[#allocation6 + $0x48] sm:$0xff]  ;;  %335 = vmatprep.subr.bf16.mxu0 %v334_v5  ;;  %v71_v14 = vld [vmem:[#allocation6 + $0x58] sm:$0xff]  ;;  %v340_v15 = vpack.c.bf16 %v66_v12, %v64_v11  ;;  %v68_v17 = vld [vmem:[#allocation6 + $0x40] sm:$0xff]  ;;  %s471_s24 = scalar_lea.vmem %s272_s23, 128  ;;  %p476_p11 = scmp.lt.s32.totalorder %s272_s23, %s272_s23 }
  0x3b   :  { %337 = vmatpush1.bf16.msra.mxu0 %v336_v9  ;;  %v342_v16 = vpack.c.bf16 %v71_v14, %v69_v13  ;;  %v70_v18 = vld [vmem:[#allocation6 + $0x50] sm:$0xff]  ;;  %v73_v19 = vld [vmem:[#allocation6 + $0x68] sm:$0xff]  ;;  %v75_v20 = vld [vmem:[#allocation6 + $0x78] sm:$0xff]  ;;  %p472_p10 = scmp.ne.s32.totalorder %s272_s23, %s471_s24  ;;  %p477_p12 = scmp.lt.s32.totalorder %s471_s24, %s471_s24 }
  0x3c   :  { %339 = vmatprep.subr.bf16.mxu0 %v338_v10  ;;  %v344_v21 = vpack.c.bf16 %v70_v18, %v68_v17  ;;  %v346_v22 = vpack.c.bf16 %v75_v20, %v73_v19  ;;  %v72_v23 = vld [vmem:[#allocation6 + $0x60] sm:$0xff]  ;;  %v74_v24 = vld [vmem:[#allocation6 + $0x70] sm:$0xff]  ;;  %v77_v25 = vld [vmem:[#allocation6 + $0x88] sm:$0xff] }
  0x3d   :  { %v79_v26 = vld [vmem:[#allocation6 + $0x98] sm:$0xff]  ;;  %v348_v27 = vpack.c.bf16 %v74_v24, %v72_v23  ;;  %v76_v29 = vld [vmem:[#allocation6 + $0x80] sm:$0xff]  ;;  %v78_v30 = vld [vmem:[#allocation6 + $0x90] sm:$0xff]  ;;  %p478_p13 = por %p477_p12, %p476_p11 }
  0x3e   :  { %v350_v28 = vpack.c.bf16 %v79_v26, %v77_v25  ;;  %v81_v31 = vld [vmem:[#allocation6 + $0xa8] sm:$0xff]  ;;  %v83_v32 = vld [vmem:[#allocation6 + $0xb8] sm:$0xff]  ;;  %v352_v33 = vpack.c.bf16 %v78_v30, %v76_v29  ;;  %v80_v35 = vld [vmem:[#allocation6 + $0xa0] sm:$0xff] }
  0x3f   :  { %341 = vmatpush1.bf16.msra.mxu0 %v340_v15  ;;  %v354_v34 = vpack.c.bf16 %v83_v32, %v81_v31  ;;  %v82_v36 = vld [vmem:[#allocation6 + $0xb0] sm:$0xff]  ;;  %v85_v37 = vld [vmem:[#allocation6 + $0xc8] sm:$0xff]  ;;  %v87_v38 = vld [vmem:[#allocation6 + $0xd8] sm:$0xff]  ;;  %p479_p0 = pnand %p478_p13, %p472_p10 }
  0x40   :  { %343 = vmatprep.subr.bf16.mxu0 %v342_v16  ;;  %v356_v39 = vpack.c.bf16 %v82_v36, %v80_v35  ;;  %v358_v40 = vpack.c.bf16 %v87_v38, %v85_v37  ;;  %v84_v41 = vld [vmem:[#allocation6 + $0xc0] sm:$0xff]  ;;  %v86_v42 = vld [vmem:[#allocation6 + $0xd0] sm:$0xff]  ;;  %v89_v43 = vld [vmem:[#allocation6 + $0xe8] sm:$0xff] }
  0x41   :  { %v91_v44 = vld [vmem:[#allocation6 + $0xf8] sm:$0xff]  ;;  %v360_v45 = vpack.c.bf16 %v86_v42, %v84_v41  ;;  %v88_v47 = vld [vmem:[#allocation6 + $0xe0] sm:$0xff]  ;;  %v90_v48 = vld [vmem:[#allocation6 + $0xf0] sm:$0xff] }
  0x42   :  { %v362_v46 = vpack.c.bf16 %v91_v44, %v89_v43  ;;  %v364_v49 = vpack.c.bf16 %v90_v48, %v88_v47  ;;  %v59_v50 = vld [vmem:[#allocation3] sm:$0xff]  ;;  %v172_v51 = vld [vmem:[#allocation8] sm:$0xff]  ;;  %v173_v52 = vld [vmem:[#allocation8 + $0x8] sm:$0xff] }
  0x43   :  { %345 = vmatpush1.bf16.msra.mxu0 %v344_v21  ;;  %v367_v53 = vpack.c.bf16 %v173_v52, %v172_v51  ;;  %v174_v54 = vld [vmem:[#allocation8 + $0x10] sm:$0xff]  ;;  %v175_v55 = vld [vmem:[#allocation8 + $0x18] sm:$0xff]  ;;  %v176_v57 = vld [vmem:[#allocation8 + $0x20] sm:$0xff] }
  0x44   :  { %347 = vmatprep.subr.bf16.mxu0 %v346_v22  ;;  %v370_v56 = vpack.c.bf16 %v175_v55, %v174_v54  ;;  %v177_v58 = vld [vmem:[#allocation8 + $0x28] sm:$0xff]  ;;  %v178_v60 = vld [vmem:[#allocation8 + $0x30] sm:$0xff]  ;;  %v179_v61 = vld [vmem:[#allocation8 + $0x38] sm:$0xff] }
  0x45   :  { %368 = vmatpush3.bf16.msra.mxu1 %v367_v53  ;;  %v373_v59 = vpack.c.bf16 %v177_v58, %v176_v57  ;;  %v376_v62 = vpack.c.bf16 %v179_v61, %v178_v60  ;;  %v180_v63 = vld [vmem:[#allocation8 + $0x40] sm:$0xff]  ;;  %v181_v2 = vld [vmem:[#allocation8 + $0x48] sm:$0xff]  ;;  %v182_v4 = vld [vmem:[#allocation8 + $0x50] sm:$0xff] }
  0x46   :  { %369 = vmatprep.subr.bf16.mxu1 %v507_v1  ;;  %v379_v3 = vpack.c.bf16 %v181_v2, %v180_v63  ;;  %v183_v5 = vld [vmem:[#allocation8 + $0x58] sm:$0xff]  ;;  %v184_v7 = vld [vmem:[#allocation8 + $0x60] sm:$0xff]  ;;  %v185_v8 = vld [vmem:[#allocation8 + $0x68] sm:$0xff] }
  0x47   :  { %349 = vmatpush1.bf16.msra.mxu0 %v348_v27  ;;  %v382_v6 = vpack.c.bf16 %v183_v5, %v182_v4  ;;  %v385_v9 = vpack.c.bf16 %v185_v8, %v184_v7  ;;  %v186_v10 = vld [vmem:[#allocation8 + $0x70] sm:$0xff]  ;;  %v187_v11 = vld [vmem:[#allocation8 + $0x78] sm:$0xff] }
  0x48   :  { %351 = vmatprep.subr.bf16.mxu0 %v350_v28  ;;  %v388_v12 = vpack.c.bf16 %v187_v11, %v186_v10 }
  0x49   :  { %371 = vmatpush3.bf16.msra.mxu1 %v370_v56 }
  0x4a   :  { %372 = vmatprep.subr.bf16.mxu1 %v507_v1 }
  0x4b   :  { %353 = vmatpush1.bf16.msra.mxu0 %v352_v33 }
  0x4c   :  { %355 = vmatprep.subr.bf16.mxu0 %v354_v34 }
  0x4d   :  { %374 = vmatpush3.bf16.msra.mxu1 %v373_v59 }
  0x4e   :  { %375 = vmatprep.subr.bf16.mxu1 %v507_v1 }
  0x4f   :  { %357 = vmatpush1.bf16.msra.mxu0 %v356_v39 }
  0x50   :  { %359 = vmatprep.subr.bf16.mxu0 %v358_v40 }
  0x51   :  { %377 = vmatpush3.bf16.msra.mxu1 %v376_v62 }
  0x52   :  { %378 = vmatprep.subr.bf16.mxu1 %v507_v1 }
  0x53   :  { %361 = vmatpush1.bf16.msra.mxu0 %v360_v45 }
  0x54   :  { %363 = vmatprep.subr.bf16.mxu0 %v362_v46 }
  0x55   :  { %380 = vmatpush3.bf16.msra.mxu1 %v379_v3 }
  0x56   :  { %381 = vmatprep.subr.bf16.mxu1 %v507_v1 }
  0x57   :  { %365 = vmatpush1.bf16.msra.mxu0 %v364_v49 }
  0x59   :  { %383 = vmatpush3.bf16.msra.mxu1 %v382_v6 }
  0x5a   :  { %157 = vmatmul.mubr.f32.vlgmr.msra.gmra.mrb[0].mxu0 %v59_v50  ;;  %384 = vmatprep.subr.bf16.mxu1 %v507_v1 }
  0x5d   :  { %386 = vmatpush3.bf16.msra.mxu1 %v385_v9 }
  0x5e   :  { %387 = vmatprep.subr.bf16.mxu1 %v507_v1 }
  0x61   :  { %389 = vmatpush3.bf16.msra.mxu1 %v388_v12 }
 0x12d   :  { %v158_v13 = vpop.f32.mrb[0].mxu0 }
 0x12e   :  { %v281_v14 = vmul.f32 -1.442695, %v158_v13  ;;  %v160_v15 = vpop.f32.mrb[1].mxu0 }
 0x130   :  { %401 = vpow2.f32 %v281_v14 }
 0x13a   :  { %v402_v16 = vpop.eup %401 }
 0x13b   :  { %v166_v17 = vadd.f32 1.0, %v402_v16 }
 0x13d   :  { %403 = vrcp.f32 %v166_v17 }
 0x147   :  { %v404_v18 = vpop.eup %403 }
 0x148   :  { %v169_v19 = vmul.f32 %v404_v18, %v158_v13 }
 0x14a   :  { %v170_v20 = vmul.f32 %v169_v19, %v160_v15 }
 0x14c   :  { %332 = vmatmul.mubr.f32.vlgmr.msra.gmra.mrb[0].mxu1 %v170_v20 }
 0x21f   :  { %v254_v1 = vpop.f32.mrb[0].mxu1 }
 0x220   :  { %264 = vst [vmem:[#allocation9] sm:$0xff] %v254_v1  ;;  %v333_v21 = vpop.f32.mrb[1].mxu1 }
 0x221   :  { %482 = shalt.err (!%p479_p0)
}
 0x222   :  { %s483_s27 = scalar_lea.hbm %s591_s3, 128 }
 0x223   :  { %p484_p1 = scmp.ne.s32.totalorder %s591_s3, %s483_s27  ;;  %p487_p2 = scmp.lt.u32.totalorder %s483_s27, %s591_s3 }
 0x225   :  { %p489_p3 = pnand %p487_p2, %p484_p1 }
 0x227   :  { %492 = shalt.err (!%p489_p3)
}
 0x228   :  { %274 = dma.vmem_to_hbm [thread:$0]  %s272_s23, 128, %s591_s3, [#allocation5]  }
 0x229   :  { %497 = dma.done.wait [#allocation5], 128  }
 0x22a   :  { %498 = vsyncadd [#allocation5], 4294967168 }
 0x22b   :  { %278 = vsyncpa [#allocation4], 1 }
 0x22c   :  { %279 = vsyncpa [#allocation7], 1 }
 0x22d   :  { %280 = vsyncpa [#allocation5], 1 }

</bundles_post_ra>
